<compile_context>
chip_gen: v7x
topology: tpu7x:2x2x1
jax: 0.10.0
libtpu: 0.0.40
codegen_flags: <defaults>
</compile_context>

<pallas_src>
import functools
import math

import numpy as np
import jax
import jax.numpy as jnp
from jax.experimental import pallas as pl
from jax.experimental.pallas import tpu as pltpu

_LANE = 128
_IF_CHUNK = 32                  # membrane rows kept in vregs per inner iteration of the IF kernel
_CONV_BLOCK_TARGET = 1 << 20    # ~1 MiB of per-step activation blocks for the conv kernels


# --------------------------------------------------------------------------------------
# VMEM budgets (per-generation: 128 MiB on v5e/v6e, 64 MiB per TensorCore on v7x)
# --------------------------------------------------------------------------------------
def _tpu_vmem_capacity():
    try:
        info = pltpu.get_tpu_info()
        for name in ("vmem_capacity_bytes", "vmem_bytes", "vmem_size_bytes"):
            v = getattr(info, name, None)
            if isinstance(v, int) and v > 0:
                return v
    except Exception:
        pass
    return 64 * 1024 * 1024   # conservative default (v7x per-TensorCore VMEM)


_VMEM_CAP = _tpu_vmem_capacity()
_VMEM_LIMIT = int(min(_VMEM_CAP * 3 // 4, 96 * 1024 * 1024))    # scoped VMEM limit per kernel
_IF_VMEM_BUDGET = int(min(_VMEM_CAP // 3, 48 * 1024 * 1024))    # per-block working set (IF tiles)


# --------------------------------------------------------------------------------------
# IF (integrate-and-fire) neuron: v += x_t; spike = (v >= vth); hard reset v -> 0
# (surrogate.ATan only changes backward; forward is a hard threshold.)
# --------------------------------------------------------------------------------------
def _if_kernel(x_ref, s_ref, *, n_steps, v_threshold, chunk):
    # x_ref/s_ref: (T, tile_rows, 128) blocks.  Rows are processed in `chunk`-row slices with the
    # (unrolled) T loop innermost so the membrane state stays in vregs: one VMEM load (x) and one
    # store (spike) per element per step, no membrane writeback.
    n_chunks = x_ref.shape[1] // chunk

    @pl.loop(0, n_chunks)
    def _(c):
        r0 = pl.multiple_of(c * chunk, chunk)
        v = jnp.zeros((chunk, x_ref.shape[2]), jnp.float32)
        for t in range(n_steps):                      # unrolled: v carried in vregs
            v = v + x_ref[t, pl.ds(r0, chunk), :].astype(jnp.float32)
            spike = v >= v_threshold
            s_ref[t, pl.ds(r0, chunk), :] = spike.astype(s_ref.dtype)
            v = jnp.where(spike, 0.0, v)              # hard reset (v_reset = 0)


def _pick_if_tile(rows, n_steps, in_itemsize, out_itemsize):
    """Largest sublane-aligned row tile whose double-buffered in+out blocks fit the VMEM budget,
    leaving >=2 grid steps when rows allow (megacore).  The per-chunk membrane state
    (_IF_CHUNK*128*4 bytes) lives in vregs and is negligible."""
    if rows <= 8:
        return rows
    per_row = 2 * n_steps * _LANE * (in_itemsize + out_itemsize)
    cap = max(8, int(_IF_VMEM_BUDGET // per_row) // 8 * 8)
    cap = min(cap, max(8, (((rows + 1) // 2) + 7) // 8 * 8))      # keep >= 2 grid steps
    tile = min(cap, (rows + 7) // 8 * 8)
    if tile >= _IF_CHUNK:
        tile = tile // _IF_CHUNK * _IF_CHUNK
    return tile


def if_node(x, v_threshold=1.0, out_dtype=jnp.bfloat16):
    """x: (T, ...) -> spikes of the same shape.  Spikes are exactly {0,1}, so they are emitted
    as bf16 to halve HBM traffic and feed the native bf16 MXU path downstream."""
    n_steps = x.shape[0]
    feat_shape = x.shape[1:]
    m = math.prod(feat_shape)
    xf = x.reshape(n_steps, m)
    pad = (-m) % _LANE
    if pad:
        # TODO(synk): rare non-lane-aligned fallback (one extra pad/slice pass); feature maps in
        # this model (B*C*H*W) are 128-aligned so this path is not taken in practice.
        xf = jnp.pad(xf, ((0, 0), (0, pad)))
    rows = (m + pad) // _LANE
    tile = _pick_if_tile(rows, n_steps, x.dtype.itemsize, jnp.dtype(out_dtype).itemsize)
    chunk = min(_IF_CHUNK, tile)
    grid = (pl.cdiv(rows, tile),)

    out = pl.pallas_call(
        functools.partial(_if_kernel, n_steps=n_steps, v_threshold=v_threshold, chunk=chunk),
        out_shape=jax.ShapeDtypeStruct((n_steps, rows, _LANE), out_dtype),
        grid_spec=pltpu.PrefetchScalarGridSpec(
            num_scalar_prefetch=0,
            grid=grid,
            in_specs=[pl.BlockSpec((n_steps, tile, _LANE), lambda i: (0, i, 0))],
            out_specs=pl.BlockSpec((n_steps, tile, _LANE), lambda i: (0, i, 0))),
        compiler_params=pltpu.CompilerParams(
            dimension_semantics=("parallel",),
            vmem_limit_bytes=_VMEM_LIMIT),
        cost_estimate=pl.CostEstimate(
            flops=int(3 * n_steps * rows * _LANE),
            transcendentals=0,
            bytes_accessed=int(n_steps * rows * _LANE
                               * (x.dtype.itemsize + jnp.dtype(out_dtype).itemsize))),
    )(xf.reshape(n_steps, rows, _LANE))

    out = out.reshape(n_steps, rows * _LANE)
    if pad:
        out = out[:, :m]
    return out.reshape((n_steps,) + feat_shape)


# --------------------------------------------------------------------------------------
# 3x3 conv machinery: tap shifts (pltpu.roll), boundary masks, im2col patch in VMEM
# --------------------------------------------------------------------------------------
_TAPS = tuple((dy, dx) for dy in (-1, 0, 1) for dx in (-1, 0, 1))


@functools.lru_cache(maxsize=None)
def _roll_convention():
    """Self-calibrate pltpu.roll's shift direction once (tiny cached probe kernel)."""
    def kernel(x_ref, o_ref):
        o_ref[...] = pltpu.roll(x_ref[...], 1, 1)

    x = jnp.tile(jnp.arange(_LANE, dtype=jnp.float32)[None, :], (8, 1))
    y = pl.pallas_call(kernel, out_shape=jax.ShapeDtypeStruct((8, _LANE), jnp.float32))(x)
    v = float(y[0, 0])
    if v == float(_LANE - 1):
        return "jnp"          # out[p] = x[(p - shift) % n]   (jnp.roll convention)
    if v == 1.0:
        return "rev"          # out[p] = x[(p + shift) % n]
    raise RuntimeError(f"unexpected pltpu.roll semantics (probe read {v})")


def _tap_shifts(img_h, img_w):
    """Static lane-rotation amounts such that rolled[:, p] == x[:, (p + dy*W + dx) % HW]."""
    hw = img_h * img_w
    rev = _roll_convention() == "rev"
    shifts = []
    for dy, dx in _TAPS:
        s = (dy * img_w + dx) % hw
        shifts.append(s if rev else (hw - s) % hw)
    return tuple(shifts)


@functools.lru_cache(maxsize=None)
def _tap_masks_np(img_h, img_w):
    hw = img_h * img_w
    p = np.arange(hw)
    hh, ww = p // img_w, p % img_w
    m = np.zeros((9, 1, hw), np.float32)
    for k, (dy, dx) in enumerate(_TAPS):
        m[k, 0] = ((hh + dy >= 0) & (hh + dy < img_h)
                   & (ww + dx >= 0) & (ww + dx < img_w)).astype(np.float32)
    return m


def _tap_masks(img_h, img_w, dtype=jnp.bfloat16):
    return jnp.asarray(_tap_masks_np(img_h, img_w), dtype=dtype)


def _build_patch(x, mask_ref, patch_ref, shifts):
    """Write the masked im2col operand (9*Cin, HW) for one image into VMEM scratch.
    Lane rotations go through the XLU; masks zero the wrapped lanes so rotation across row /
    image boundaries never contributes (equivalent to zero padding=1)."""
    c_in = x.shape[0]
    for k in range(9):
        rolled = x if shifts[k] == 0 else pltpu.roll(x, shifts[k], 1)
        patch_ref[k * c_in:(k + 1) * c_in, :] = rolled * mask_ref[k]


def _pick_group(n_images, bytes_per_image):
    """Images per conv grid step: target ~1 MiB activation blocks (amortizes per-step overhead
    and tiny DMAs) while keeping >=2 parallel grid steps for megacore whenever that does not
    shrink blocks below ~256 KiB; must divide n_images."""
    cap = max(1, int(_CONV_BLOCK_TARGET // max(1, bytes_per_image)))
    if n_images >= 2 and bytes_per_image * min(cap, n_images) >= (256 << 10):
        cap = min(cap, max(1, n_images // 2))
    best = 1
    for d in range(1, n_images + 1):
        if d > cap:
            break
        if n_images % d == 0:
            best = d
    return best


# --------------------------------------------------------------------------------------
# Kernel 1: conv3x3 + folded BN1 + temb bias + IF neuron2 (fused epilogue)
# --------------------------------------------------------------------------------------
def _conv1_bn_temb_if_kernel(s1_ref, w_ref, bias_ref, mask_ref, s2_ref, patch_ref, v_ref,
                             *, shifts, group, v_threshold):
    t = pl.program_id(1)

    @pl.when(t == 0)
    def _():
        v_ref[...] = jnp.zeros_like(v_ref)

    @pl.loop(0, group)
    def _(g):
        _build_patch(s1_ref[0, g], mask_ref, patch_ref, shifts)
        h = jnp.dot(w_ref[...], patch_ref[...], preferred_element_type=jnp.float32)
        h = h + bias_ref[0, g]                               # folded BN bias + temb, (Cout,1)
        v = v_ref[g] + h                                     # IF neuron2 (state across T)
        spike = v >= v_threshold
        s2_ref[0, g] = spike.astype(s2_ref.dtype)
        v_ref[g] = jnp.where(spike, 0.0, v)                  # hard reset


def conv1_bn_temb_if(s1, w2d, bias_img, *, img_h, img_w, v_threshold=1.0):
    """s1: (T, B, Cin, HW) bf16 spikes.  w2d: (Cout, 9*Cin) bf16 with BN scale folded in.
    bias_img: (T, B, Cout) f32 = folded BN bias + temb projection.
    Returns s2 spikes (T, B, Cout, HW) bf16; h1 never round-trips HBM."""
    n_steps, batch, c_in, hw = s1.shape
    c_out = w2d.shape[0]
    assert hw == img_h * img_w
    masks = _tap_masks(img_h, img_w, jnp.bfloat16)
    shifts = _tap_shifts(img_h, img_w)
    group = _pick_group(batch, hw * (2 * c_in + 2 * c_out + 4 * c_out))
    grid = (batch // group, n_steps)

    flops = 2 * n_steps * batch * hw * c_out * 9 * c_in
    bytes_acc = (2 * s1.size + 2 * n_steps * batch * c_out * hw
                 + 4 * bias_img.size + 2 * w2d.size + 2 * masks.size)

    return pl.pallas_call(
        functools.partial(_conv1_bn_temb_if_kernel, shifts=shifts, group=group,
                          v_threshold=v_threshold),
        out_shape=jax.ShapeDtypeStruct((n_steps, batch, c_out, hw), jnp.bfloat16),
        grid_spec=pltpu.PrefetchScalarGridSpec(
            num_scalar_prefetch=0,
            grid=grid,
            in_specs=[
                pl.BlockSpec((1, group, c_in, hw), lambda b, t: (t, b, 0, 0)),
                pl.BlockSpec((c_out, 9 * c_in), lambda b, t: (0, 0)),
                pl.BlockSpec((1, group, c_out, 1), lambda b, t: (t, b, 0, 0)),
                pl.BlockSpec((9, 1, hw), lambda b, t: (0, 0, 0)),
            ],
            out_specs=pl.BlockSpec((1, group, c_out, hw), lambda b, t: (t, b, 0, 0)),
            scratch_shapes=[pltpu.VMEM((9 * c_in, hw), jnp.bfloat16),      # im2col patch
                            pltpu.VMEM((group, c_out, hw), jnp.float32)]),  # membrane state
        compiler_params=pltpu.CompilerParams(
            dimension_semantics=("parallel", "arbitrary"),
            vmem_limit_bytes=_VMEM_LIMIT),
        cost_estimate=pl.CostEstimate(flops=int(flops), transcendentals=0,
                                      bytes_accessed=int(bytes_acc)),
    )(s1.astype(jnp.bfloat16), w2d.astype(jnp.bfloat16),
      bias_img.reshape(n_steps, batch, c_out, 1).astype(jnp.float32), masks)


# --------------------------------------------------------------------------------------
# Kernel 2: conv3x3 + folded BN2 + shortcut (1x1 conv or identity)
# --------------------------------------------------------------------------------------
def _conv2_bn_shortcut_kernel(s_ref, w_ref, bias_ref, mask_ref, res_ref, *rest,
                              shifts, group, shortcut):
    if shortcut == "conv1x1":
        scw_ref, scb_ref, o_ref, patch_ref = rest
    else:
        o_ref, patch_ref = rest

    @pl.loop(0, group)
    def _(g):
        _build_patch(s_ref[g], mask_ref, patch_ref, shifts)
        out = jnp.dot(w_ref[...], patch_ref[...], preferred_element_type=jnp.float32)
        out = out + bias_ref[...]
        if shortcut == "conv1x1":
            out = out + jnp.dot(scw_ref[...], res_ref[g],
                                preferred_element_type=jnp.float32) + scb_ref[...]
        else:
            out = out + res_ref[g]
        o_ref[g] = out.astype(o_ref.dtype)


def conv2_bn_shortcut(s2, w2d, bias, x_res, *, img_h, img_w, sc_w=None, sc_b=None):
    """s2: (N, C, HW) bf16 spikes; w2d: (Cout, 9*C) bf16 BN-folded; bias: (Cout,) f32 folded;
    x_res: (N, Cres, HW) f32 residual.  1x1-conv shortcut when sc_w is given, else identity."""
    n, c, hw = s2.shape
    c_out = w2d.shape[0]
    c_res = x_res.shape[1]
    assert hw == img_h * img_w
    masks = _tap_masks(img_h, img_w, jnp.bfloat16)
    shifts = _tap_shifts(img_h, img_w)
    group = _pick_group(n, hw * (2 * c + 4 * c_out + 4 * c_res))
    grid = (n // group,)
    shortcut = "conv1x1" if sc_w is not None else "identity"

    in_specs = [
        pl.BlockSpec((group, c, hw), lambda i: (i, 0, 0)),
        pl.BlockSpec((c_out, 9 * c), lambda i: (0, 0)),
        pl.BlockSpec((c_out, 1), lambda i: (0, 0)),
        pl.BlockSpec((9, 1, hw), lambda i: (0, 0, 0)),
        pl.BlockSpec((group, c_res, hw), lambda i: (i, 0, 0)),
    ]
    args = [s2.astype(jnp.bfloat16), w2d.astype(jnp.bfloat16),
            bias.reshape(c_out, 1).astype(jnp.float32), masks, x_res.astype(jnp.float32)]
    flops = 2 * n * hw * c_out * 9 * c
    bytes_acc = 2 * s2.size + 4 * x_res.size + 4 * n * c_out * hw + 2 * w2d.size + 2 * masks.size
    if shortcut == "conv1x1":
        in_specs += [pl.BlockSpec((c_out, c_res), lambda i: (0, 0)),
                     pl.BlockSpec((c_out, 1), lambda i: (0, 0))]
        args += [sc_w.astype(jnp.float32), sc_b.reshape(c_out, 1).astype(jnp.float32)]
        flops += 2 * n * hw * c_out * c_res

    return pl.pallas_call(
        functools.partial(_conv2_bn_shortcut_kernel, shifts=shifts, group=group,
                          shortcut=shortcut),
        out_shape=jax.ShapeDtypeStruct((n, c_out, hw), jnp.float32),
        grid_spec=pltpu.PrefetchScalarGridSpec(
            num_scalar_prefetch=0,
            grid=grid,
            in_specs=in_specs,
            out_specs=pl.BlockSpec((group, c_out, hw), lambda i: (i, 0, 0)),
            scratch_shapes=[pltpu.VMEM((9 * c, hw), jnp.bfloat16)]),
        compiler_params=pltpu.CompilerParams(
            dimension_semantics=("parallel",),
            vmem_limit_bytes=_VMEM_LIMIT),
        cost_estimate=pl.CostEstimate(flops=int(flops), transcendentals=0,
                                      bytes_accessed=int(bytes_acc)),
    )(*args)


# --------------------------------------------------------------------------------------
# Full Spk_ResBlock forward
# --------------------------------------------------------------------------------------
def _fold_bn(gamma, beta, mean, var, conv_bias, eps=1e-5):
    # TODO(synk): BatchNorm is applied in folded inference form (running statistics); train-mode
    # batch statistics are not computed in-kernel.
    scale = gamma / jnp.sqrt(var + eps)
    return scale, beta + scale * (conv_bias - mean)


def _conv_w2d(conv_w, scale):
    """(Cout, Cin, 3, 3) -> (Cout, 9*Cin) with the BN scale folded in; column block k=(ky*3+kx)
    holds w[:, :, ky, kx].  Cast to bf16: spikes are {0,1}, so the MXU uses its native bf16 path."""
    c_out, c_in = conv_w.shape[:2]
    w2d = jnp.transpose(conv_w, (0, 2, 3, 1)).reshape(c_out, 9 * c_in)
    return (w2d * scale[:, None]).astype(jnp.bfloat16)


def temb_projection(temb, w, b):
    """Linear(Swish(temb)) — GEMV-scale, left to XLA (fuses into the bias preparation)."""
    t = temb.astype(jnp.float32)
    t = t * jax.nn.sigmoid(t)
    return jnp.dot(t, w.astype(jnp.float32),
                   precision=jax.lax.Precision.HIGHEST) + b.astype(jnp.float32)


def spk_resblock_forward(x, temb, params, return_intermediates=False):
    n_steps, batch, c_in, img_h, img_w = x.shape
    c_out = params["conv1_w"].shape[0]
    hw = img_h * img_w
    tb = n_steps * batch

    # neuron1 (Pallas IF kernel) -> bf16 spikes
    s1 = if_node(x).reshape(n_steps, batch, c_in, hw)

    # temb projection + conv1/BN1 folding
    tproj = temb_projection(temb, params["temb_w"], params["temb_b"])            # (T, B, Cout)
    scale1, bias1 = _fold_bn(params["bn1_gamma"], params["bn1_beta"],
                             params["bn1_mean"], params["bn1_var"], params["conv1_b"])
    w1 = _conv_w2d(params["conv1_w"], scale1)
    bias1_img = bias1[None, None, :] + tproj                                      # (T, B, Cout)

    # conv1 + BN1 + temb + neuron2 (fused): h1 never materialized in HBM
    s2 = conv1_bn_temb_if(s1, w1, bias1_img, img_h=img_h, img_w=img_w)            # bf16 spikes

    # conv2 + BN2 + shortcut
    scale2, bias2 = _fold_bn(params["bn2_gamma"], params["bn2_beta"],
                             params["bn2_mean"], params["bn2_var"], params["conv2_b"])
    w2 = _conv_w2d(params["conv2_w"], scale2)
    x_res = x.reshape(tb, c_in, hw)
    if c_in != c_out:
        h2 = conv2_bn_shortcut(s2.reshape(tb, c_out, hw), w2, bias2, x_res,
                               img_h=img_h, img_w=img_w,
                               sc_w=params["sc_w"], sc_b=params["sc_b"])
    else:
        h2 = conv2_bn_shortcut(s2.reshape(tb, c_out, hw), w2, bias2, x_res,
                               img_h=img_h, img_w=img_w)

    # TODO(synk): Spike_SelfAttention (attn=True) is not implemented; attn=False -> Identity.
    out = h2.reshape(n_steps, batch, c_out, img_h, img_w)
    if return_intermediates:
        return out, dict(s1=s1, s2=s2, tproj=tproj, w1=w1, w2=w2,
                         bias1_img=bias1_img, bias2=bias2)
    return out


# --------------------------------------------------------------------------------------
# Pure-JAX references for verification
# --------------------------------------------------------------------------------------
def _if_node_ref(x, v_threshold=1.0):
    v = jnp.zeros_like(x[0])
    spikes = []
    for t in range(x.shape[0]):
        v = v + x[t]
        s = (v >= v_threshold).astype(x.dtype)
        v = jnp.where(s > 0, jnp.zeros_like(v), v)
        spikes.append(s)
    return jnp.stack(spikes)


if __name__ == "__main__":
    T, B, C_IN, C_OUT, H, W, TDIM = 4, 2, 4, 8, 16, 16, 32
    TB, HW = T * B, H * W

    key = jax.random.PRNGKey(0)
    ks = jax.random.split(key, 20)
    x = jax.random.normal(ks[0], (T, B, C_IN, H, W), jnp.float32)
    temb = jax.random.normal(ks[1], (T, B, TDIM), jnp.float32)

    params = dict(
        conv1_w=0.25 * jax.random.normal(ks[2], (C_OUT, C_IN, 3, 3), jnp.float32),
        conv1_b=0.1 * jax.random.normal(ks[3], (C_OUT,), jnp.float32),
        bn1_gamma=1.0 + 0.1 * jax.random.normal(ks[4], (C_OUT,), jnp.float32),
        bn1_beta=0.1 * jax.random.normal(ks[5], (C_OUT,), jnp.float32),
        bn1_mean=0.1 * jax.random.normal(ks[6], (C_OUT,), jnp.float32),
        bn1_var=1.0 + 0.2 * jax.random.uniform(ks[7], (C_OUT,), jnp.float32),
        temb_w=0.2 * jax.random.normal(ks[8], (TDIM, C_OUT), jnp.float32),
        temb_b=0.1 * jax.random.normal(ks[9], (C_OUT,), jnp.float32),
        conv2_w=0.25 * jax.random.normal(ks[10], (C_OUT, C_OUT, 3, 3), jnp.float32),
        conv2_b=0.1 * jax.random.normal(ks[11], (C_OUT,), jnp.float32),
        bn2_gamma=1.0 + 0.1 * jax.random.normal(ks[12], (C_OUT,), jnp.float32),
        bn2_beta=0.1 * jax.random.normal(ks[13], (C_OUT,), jnp.float32),
        bn2_mean=0.1 * jax.random.normal(ks[14], (C_OUT,), jnp.float32),
        bn2_var=1.0 + 0.2 * jax.random.uniform(ks[15], (C_OUT,), jnp.float32),
        sc_w=0.3 * jax.random.normal(ks[16], (C_OUT, C_IN), jnp.float32),
        sc_b=0.1 * jax.random.normal(ks[17], (C_OUT,), jnp.float32),
    )

    out, aux = spk_resblock_forward(x, temb, params, return_intermediates=True)
    out = jax.block_until_ready(out)
    assert out.shape == (T, B, C_OUT, H, W), out.shape

    # ---- stage 1: neuron1 (exact: same f32 adds / hard threshold) ----
    s1_ref = _if_node_ref(x)
    s1_k = aux["s1"].astype(jnp.float32).reshape(T, B, C_IN, H, W)
    assert float(jnp.max(jnp.abs(s1_k - s1_ref))) < 1e-6, "neuron1 mismatch"

    # ---- stage 2: fused conv1+BN1+temb+neuron2.  Reference consumes the kernel's s1 and the
    # same bf16-folded weights; positions whose reference membrane ever lands within a small
    # margin of the threshold are excluded so benign f32 summation-order differences between the
    # MXU dot and lax.conv cannot flip discrete spikes into false failures. ----
    w1_4d = aux["w1"].astype(jnp.float32).reshape(C_OUT, 3, 3, C_IN).transpose(0, 3, 1, 2)
    h1_ref = jax.lax.conv_general_dilated(
        s1_k.reshape(TB, C_IN, H, W), w1_4d, (1, 1), "SAME",
        dimension_numbers=("NCHW", "OIHW", "NCHW"),
        precision=jax.lax.Precision.HIGHEST).reshape(T, B, C_OUT, HW)
    h1_ref = h1_ref + aux["bias1_img"][..., None]
    v = jnp.zeros((B, C_OUT, HW), jnp.float32)
    s2_ref_l, v_pre_l = [], []
    for t in range(T):
        v = v + h1_ref[t]
        v_pre_l.append(v)
        sp = (v >= 1.0).astype(jnp.float32)
        v = jnp.where(sp > 0, 0.0, v)
        s2_ref_l.append(sp)
    s2_ref = jnp.stack(s2_ref_l)
    v_pre = jnp.stack(v_pre_l)
    ambiguous = jnp.any(jnp.abs(v_pre - 1.0) < 5e-3, axis=0)           # (B, C_OUT, HW)
    frac_amb = float(jnp.mean(ambiguous.astype(jnp.float32)))
    assert frac_amb < 0.25, f"threshold-ambiguity mask excludes too much: {frac_amb}"
    s2_k = aux["s2"].astype(jnp.float32)
    flips = jnp.where(ambiguous[None], 0.0, jnp.abs(s2_k - s2_ref))
    assert float(jnp.max(flips)) < 0.5, "conv1+bn1+temb+neuron2 mismatch"

    # ---- stage 3: conv2+BN2+shortcut (reference consumes the kernel's s2) ----
    w2_4d = aux["w2"].astype(jnp.float32).reshape(C_OUT, 3, 3, C_OUT).transpose(0, 3, 1, 2)
    h2_ref = jax.lax.conv_general_dilated(
        s2_k.reshape(TB, C_OUT, H, W), w2_4d, (1, 1), "SAME",
        dimension_numbers=("NCHW", "OIHW", "NCHW"),
        precision=jax.lax.Precision.HIGHEST)
    h2_ref = h2_ref + aux["bias2"][None, :, None, None]
    h2_ref = h2_ref + (jnp.einsum("oc,nchw->nohw", params["sc_w"], x.reshape(TB, C_IN, H, W),
                                  precision=jax.lax.Precision.HIGHEST)
                       + params["sc_b"][None, :, None, None])
    got = out.reshape(TB, C_OUT, H, W)
    err = float(jnp.max(jnp.abs(got - h2_ref)))
    assert bool(jnp.allclose(got, h2_ref, atol=2e-2, rtol=2e-2)), \
        f"conv2+bn2+shortcut mismatch: max|err|={err}"

    print("KERNEL_OK")
</pallas_src>

<mosaic_0001>
module attributes {stable_mosaic.version = 11 : i64} {
  func.func @_if_kernel(%arg0: i32, %arg1: memref<4x8x128xf32, #tpu.memory_space<vmem>>, %arg2: memref<4x8x128xbf16, #tpu.memory_space<vmem>>) attributes {dimension_semantics = [#tpu.dimension_semantics<parallel>], iteration_bounds = array<i64: 2>, scalar_prefetch = 0 : i64, scratch_operands = 0 : i64, tpu.core_type = #tpu.core_type<tc>, window_params = [{transform_indices = @transform_0, window_bounds = array<i64: 4, 8, 128>}, {transform_indices = @transform_1, window_bounds = array<i64: 4, 8, 128>}]} {
    %c0_i32 = arith.constant 0 : i32
    %c1_i32 = arith.constant 1 : i32
    %0 = arith.muli %c0_i32, %c1_i32 : i32
    %c0_i32_0 = arith.constant 0 : i32
    %1 = arith.addi %c0_i32_0, %0 : i32
    %c8_i32 = arith.constant 8 : i32
    %2 = arith.muli %1, %c8_i32 : i32
    %3 = tpu.assume_multiple %2, 8 : i32
    %cst = arith.constant 0.000000e+00 : f32
    %4 = vector.broadcast %cst : f32 to vector<8x128xf32>
    %c0 = arith.constant 0 : index
    %5 = arith.index_cast %3 : i32 to index
    %c0_1 = arith.constant 0 : index
    %6 = vector.load %arg1[%c0, %5, %c0_1] : memref<4x8x128xf32, #tpu.memory_space<vmem>>, vector<1x8x128xf32>
    %7 = vector.shape_cast %6 : vector<1x8x128xf32> to vector<8x128xf32>
    %8 = arith.addf %4, %7 : vector<8x128xf32>
    %cst_2 = arith.constant 1.000000e+00 : f32
    %9 = vector.broadcast %cst_2 : f32 to vector<8x128xf32>
    %10 = arith.cmpf oge, %8, %9 : vector<8x128xf32>
    %11 = arith.extui %10 : vector<8x128xi1> to vector<8x128xi32>
    %12 = arith.sitofp %11 : vector<8x128xi32> to vector<8x128xf32>
    %13 = arith.truncf %12 : vector<8x128xf32> to vector<8x128xbf16>
    %c0_3 = arith.constant 0 : index
    %14 = arith.index_cast %3 : i32 to index
    %c0_4 = arith.constant 0 : index
    %15 = vector.load %arg2[%c0_3, %14, %c0_4] : memref<4x8x128xbf16, #tpu.memory_space<vmem>>, vector<1x8x128xbf16>
    %16 = vector.shape_cast %15 : vector<1x8x128xbf16> to vector<8x128xbf16>
    %17 = vector.shape_cast %13 : vector<8x128xbf16> to vector<1x8x128xbf16>
    tpu.vector_store %arg2[%c0_3, %14, %c0_4], %17 {strides = array<i32>} : memref<4x8x128xbf16, #tpu.memory_space<vmem>>, vector<1x8x128xbf16>,
    %cst_5 = arith.constant 0.000000e+00 : f32
    %18 = vector.broadcast %cst_5 : f32 to vector<8x128xf32>
    %19 = arith.select %10, %18, %8 : vector<8x128xi1>, vector<8x128xf32>
    %c1 = arith.constant 1 : index
    %20 = arith.index_cast %3 : i32 to index
    %c0_6 = arith.constant 0 : index
    %21 = vector.load %arg1[%c1, %20, %c0_6] : memref<4x8x128xf32, #tpu.memory_space<vmem>>, vector<1x8x128xf32>
    %22 = vector.shape_cast %21 : vector<1x8x128xf32> to vector<8x128xf32>
    %23 = arith.addf %19, %22 : vector<8x128xf32>
    %cst_7 = arith.constant 1.000000e+00 : f32
    %24 = vector.broadcast %cst_7 : f32 to vector<8x128xf32>
    %25 = arith.cmpf oge, %23, %24 : vector<8x128xf32>
    %26 = arith.extui %25 : vector<8x128xi1> to vector<8x128xi32>
    %27 = arith.sitofp %26 : vector<8x128xi32> to vector<8x128xf32>
    %28 = arith.truncf %27 : vector<8x128xf32> to vector<8x128xbf16>
    %c1_8 = arith.constant 1 : index
    %29 = arith.index_cast %3 : i32 to index
    %c0_9 = arith.constant 0 : index
    %30 = vector.load %arg2[%c1_8, %29, %c0_9] : memref<4x8x128xbf16, #tpu.memory_space<vmem>>, vector<1x8x128xbf16>
    %31 = vector.shape_cast %30 : vector<1x8x128xbf16> to vector<8x128xbf16>
    %32 = vector.shape_cast %28 : vector<8x128xbf16> to vector<1x8x128xbf16>
    tpu.vector_store %arg2[%c1_8, %29, %c0_9], %32 {strides = array<i32>} : memref<4x8x128xbf16, #tpu.memory_space<vmem>>, vector<1x8x128xbf16>,
    %cst_10 = arith.constant 0.000000e+00 : f32
    %33 = vector.broadcast %cst_10 : f32 to vector<8x128xf32>
    %34 = arith.select %25, %33, %23 : vector<8x128xi1>, vector<8x128xf32>
    %c2 = arith.constant 2 : index
    %35 = arith.index_cast %3 : i32 to index
    %c0_11 = arith.constant 0 : index
    %36 = vector.load %arg1[%c2, %35, %c0_11] : memref<4x8x128xf32, #tpu.memory_space<vmem>>, vector<1x8x128xf32>
    %37 = vector.shape_cast %36 : vector<1x8x128xf32> to vector<8x128xf32>
    %38 = arith.addf %34, %37 : vector<8x128xf32>
    %cst_12 = arith.constant 1.000000e+00 : f32
    %39 = vector.broadcast %cst_12 : f32 to vector<8x128xf32>
    %40 = arith.cmpf oge, %38, %39 : vector<8x128xf32>
    %41 = arith.extui %40 : vector<8x128xi1> to vector<8x128xi32>
    %42 = arith.sitofp %41 : vector<8x128xi32> to vector<8x128xf32>
    %43 = arith.truncf %42 : vector<8x128xf32> to vector<8x128xbf16>
    %c2_13 = arith.constant 2 : index
    %44 = arith.index_cast %3 : i32 to index
    %c0_14 = arith.constant 0 : index
    %45 = vector.load %arg2[%c2_13, %44, %c0_14] : memref<4x8x128xbf16, #tpu.memory_space<vmem>>, vector<1x8x128xbf16>
    %46 = vector.shape_cast %45 : vector<1x8x128xbf16> to vector<8x128xbf16>
    %47 = vector.shape_cast %43 : vector<8x128xbf16> to vector<1x8x128xbf16>
    tpu.vector_store %arg2[%c2_13, %44, %c0_14], %47 {strides = array<i32>} : memref<4x8x128xbf16, #tpu.memory_space<vmem>>, vector<1x8x128xbf16>,
    %cst_15 = arith.constant 0.000000e+00 : f32
    %48 = vector.broadcast %cst_15 : f32 to vector<8x128xf32>
    %49 = arith.select %40, %48, %38 : vector<8x128xi1>, vector<8x128xf32>
    %c3 = arith.constant 3 : index
    %50 = arith.index_cast %3 : i32 to index
    %c0_16 = arith.constant 0 : index
    %51 = vector.load %arg1[%c3, %50, %c0_16] : memref<4x8x128xf32, #tpu.memory_space<vmem>>, vector<1x8x128xf32>
    %52 = vector.shape_cast %51 : vector<1x8x128xf32> to vector<8x128xf32>
    %53 = arith.addf %49, %52 : vector<8x128xf32>
    %cst_17 = arith.constant 1.000000e+00 : f32
    %54 = vector.broadcast %cst_17 : f32 to vector<8x128xf32>
    %55 = arith.cmpf oge, %53, %54 : vector<8x128xf32>
    %56 = arith.extui %55 : vector<8x128xi1> to vector<8x128xi32>
    %57 = arith.sitofp %56 : vector<8x128xi32> to vector<8x128xf32>
    %58 = arith.truncf %57 : vector<8x128xf32> to vector<8x128xbf16>
    %c3_18 = arith.constant 3 : index
    %59 = arith.index_cast %3 : i32 to index
    %c0_19 = arith.constant 0 : index
    %60 = vector.load %arg2[%c3_18, %59, %c0_19] : memref<4x8x128xbf16, #tpu.memory_space<vmem>>, vector<1x8x128xbf16>
    %61 = vector.shape_cast %60 : vector<1x8x128xbf16> to vector<8x128xbf16>
    %62 = vector.shape_cast %58 : vector<8x128xbf16> to vector<1x8x128xbf16>
    tpu.vector_store %arg2[%c3_18, %59, %c0_19], %62 {strides = array<i32>} : memref<4x8x128xbf16, #tpu.memory_space<vmem>>, vector<1x8x128xbf16>,
    %c1_i32_20 = arith.constant 1 : i32
    return
  }
  func.func @transform_0(%arg0: i32) -> (i32, i32, i32) {
    %c0_i32 = arith.constant 0 : i32
    %c0_i32_0 = arith.constant 0 : i32
    %c0_i32_1 = arith.constant 0 : i32
    return %c0_i32, %arg0, %c0_i32_0 : i32, i32, i32
  }
  func.func @transform_1(%arg0: i32) -> (i32, i32, i32) {
    %c0_i32 = arith.constant 0 : i32
    %c0_i32_0 = arith.constant 0 : i32
    %c0_i32_1 = arith.constant 0 : i32
    return %c0_i32, %arg0, %c0_i32_0 : i32, i32, i32
  }
}

</mosaic_0001>

<bundles_post_ra>
// kernel: tpu_custom_call.1
= control target key start
LH: loop header
LB: loop body
LE: loop exit
PB: predicated region body
PF: predicated region fallthrough
CT: control target
= control target key end

     0   :  { %6 = vsyncpa [#allocation3], 0  ;;  %s629_s0 = inlined_call_operand.hbm [shape: f32[4,16,128], index: 0, kind: input, shape index: {}]   ;;  %s630_s1 = inlined_call_operand.hbm [shape: bf16[4,16,128], index: 1, kind: output, shape index: {}]  }
   0x1   :  { %8 = vsyncpa [#allocation3 + $0x1], 0 }
   0x2   :  { %9 = vsyncpa [#allocation4], 0 }
   0x3   :  { %11 = vsyncpa [#allocation4 + $0x1], 0  ;;  %s464_s6 = smov 0   ;;  %s466_s7 = smov 0  }
   0x4   :  { %s468_s8 = smov 0   ;;  %s470_s9 = smov 0  }
   0x5 LB: > { %s485_s10 = sadd.s32 4294967295, %s443_s9   ;;  %s272_s11 = sadd.s32 4294967294, %s443_s9   ;;  %s443_s9 = sphi %s470_s9, %s644_s9   ;;  %s439_s8 = sphi %s468_s8, %s643_s8   ;;  %s435_s7 = sphi %s466_s7, %s642_s7   ;;  %s431_s6 = sphi %s464_s6, %s641_s6  }
   0x6   : > { %s489_s12 = sadd.s32 1, %s443_s9   ;;  %s24_s13 = sadd.s32 1, %s439_s8 }
   0x7   : > { %s21_s14 = ssub.s32 %s443_s9, %s489_s12  ;;  %p31_p0 = scmp.ne.s32.totalorder %s439_s8, %s435_s7 }
   0x8   : > { %p22_p1 = scmp.eq.s32.totalorder %s21_s14, 0  ;;  %p32_p2 = scmp.eq.s32.totalorder %s443_s9, 0 }
   0x9   : > { %p37_p3 = scmp.ne.s32.totalorder %s435_s7, %s431_s6  ;;  %p38_p4 = scmp.eq.s32.totalorder %s485_s10, 0 }
   0xa   : > { %s501_s15 = scalar_select %p22_p1, %s439_s8, %s24_s13  }
   0xb   : > { %p503_p5 = por %p32_p2, %p31_p0  ;;  %p507_p6 = por %p38_p4, %p37_p3 }
   0xc   : > { %p61_p7 = scmp.eq.s32.totalorder %s485_s10, 1  ;;  %p67_p8 = scmp.eq.s32.totalorder %s272_s11, 1 }
   0xd   : > { %p306_p10 = scmp.lt.s32.totalorder %s443_s9, 2  ;;  %s87_s20 = sand.u32 1, %s439_s8  }
   0xe   : > { %p514_p11 = por %p61_p7, %p31_p0  ;;  %p518_p12 = por %p67_p8, %p37_p3 }
   0xf   : > { %s276_s21 = sshll.u32 %s443_s9, 7  ;;  %s275_s22 = sshll.u32 %s87_s20, 5 }
  0x10   : > { %s634_s18 = scalar_select %p514_p11, 1, 0 }
  0x11   : > { %s635_s19 = scalar_select %p518_p12, 1, 0 }
  0x12   : > { %s527_s25 = scalar_lea.hbm %s629_s0, %s276_s21  ;;  %s91_s26 = scalar_lea.vmem [#allocation2], %s275_s22 }
  0x13   : > { %s97_s27 = sshll.u32 %s91_s26, 4  ;;  %p531_p13 = pnand %p306_p10, %p503_p5  ;;  %s535_s27 = int_to_ptr.vmem [resolvable:$true] %s97_s27 }
  0x14   : > { %s538_s29 = scalar_lea.sflag [#allocation3], %s87_s20  ;;  %s347_s30 = scalar_lea.hbm %s527_s25, 512 }
  0x15   : > { %p348_p1 = scmp.ne.s32.totalorder %s527_s25, %s347_s30  ;;  %p349_p2 = pneg %p531_p13 }
  0x16   : > { %s352_s4 = scalar_lea.hbm %s629_s0, 1024  ;;  %p353_p5 = scmp.lt.u32.totalorder %s527_s25, %s629_s0 }
  0x17   : > { %p350_p3 = pnand %p349_p2, %p348_p1  ;;  %p354_p7 = scmp.lt.u32.totalorder %s352_s4, %s347_s30 }
  0x18   : > { %p356_p10 = scmp.lt.u32.totalorder %s347_s30, %s527_s25 }
  0x19   : > { %p351_p4 = pneg %p350_p3  ;;  %p355_p8 = por %p354_p7, %p353_p5 }
  0x1b   : > { %p357_p9 = por %p356_p10, %p355_p8 }
  0x1d   : > { %p358_p0 = pnand %p357_p9, %p351_p4 }
  0x1f   : > { %361 = shalt.err (!%p358_p0)
}
  0x20   : > { %s362_s13 = scalar_lea.vmem %s535_s27, 512  ;;  %s445_s14 = smov [#allocation2]  }
  0x21   : > { %p363_p1 = scmp.ne.s32.totalorder %s535_s27, %s362_s13  ;;  %s367_s16 = sshll.u32 %s445_s14, 4  ;;  %s368_s16 = int_to_ptr.vmem [resolvable:$false] %s367_s16 }
  0x22   : > { %s369_s20 = scalar_lea.vmem %s368_s16, 1024  ;;  %p370_p11 = scmp.lt.s32.totalorder %s535_s27, %s368_s16 }
  0x23   : > { %p365_p3 = pnand %p363_p1, %p349_p2  ;;  %p371_p5 = scmp.lt.s32.totalorder %s369_s20, %s362_s13 }
  0x25   : > { %p366_p12 = pneg %p365_p3  ;;  %p372_p7 = por %p371_p5, %p370_p11 }
  0x27   : > { %p373_p8 = pnand %p372_p7, %p366_p12 }
  0x29   : > { %376 = shalt.err (!%p373_p8)
}
  0x2a   : > { %s446_s21 = smov 256   ;;  %s447_s22 = smov 128  }
  0x2b   : > { %s448_s23 = smov 8   ;;  %p105_p9 = scmp.lt.s32.totalorder %s443_s9, 3 }
  0x2c   : > { %301 = dma.hbm_to_vmem [thread:$0]  (!%p531_p13), %s527_s25, 512, %s535_s27, %s538_s29, %s446_s21, %s447_s22, %s448_s23  }
  0x2d   : > { %p637_p0 = scmp.ge.s32.totalorder %s443_s9, 1 }
  0x2f   : > { %p106_p2 = pnand %p637_p0, %p105_p9 }
  0x30   : > { %s570_s24 = sand.u32 (!%p106_p2), 1, %s435_s7  }
  0x31   : > { %109 = sbr.rel (%p106_p2) target bundleno = 90 (0x5a), region = 24  ;;  %s278_s26 = sshll.u32 (!%p106_p2), %s570_s24, 5 }
  0x32   : > { %s112_s30 = scalar_lea.sflag (!%p106_p2), [#allocation3], %s570_s24  ;;  %s115_s2 = scalar_lea.vmem (!%p106_p2), [#allocation2], %s278_s26 }
  0x38   : > { %422 = dma.done.wait (%p507_p6), %s112_s30, 512  }
  0x39   : > { %424 = vsyncadd (%p507_p6), %s112_s30, 4294966784  ;;  %s279_s25 = sshll.u32 %s570_s24, 4  ;;  %v134_v0 = vld [vmem:[%s115_s2] sm:$0xff]  ;;  %v281_v1 = vld [vmem:[%s115_s2 + $0x8] sm:$0xff]  ;;  %v449_v2 = vmov 0.0   ;;  %s291_s17 = sshll.u32 %s485_s10, 6 }
  0x3a   : > { %vm136_vm0 = vcmp.ge.f32.partialorder %v134_v0, 1.0  ;;  %v284_v7 = vld [vmem:[%s115_s2 + $0x10] sm:$0xff]  ;;  %s133_s27 = scalar_lea.vmem [#allocation5], %s279_s25  ;;  %v287_v12 = vld [vmem:[%s115_s2 + $0x18] sm:$0xff]  ;;  %s583_s4 = scalar_lea.hbm %s630_s1, %s291_s17 }
  0x3b   : > { %v280_v3 = vsel %vm136_vm0, 1.0, %v449_v2  ;;  %v141_v4 = vsel %vm136_vm0, 0.0, %v134_v0  ;;  %s193_s28 = sshll.u32 %s133_s27, 4  ;;  %s181_s5 = scalar_lea.sflag [#allocation4], %s570_s24  ;;  %s585_s28 = int_to_ptr.vmem [resolvable:$true] %s193_s28 }
  0x3c   : > { %v139_v5 = vpack.c.bf16 %v280_v3, %v280_v3  ;;  %v145_v6 = vadd.f32 %v281_v1, %v141_v4  ;;  %s377_s10 = scalar_lea.vmem %s585_s28, 256  ;;  %p638_p11 = scmp.ne.s32.totalorder %s634_s18, 0 }
  0x3d   : > { %p378_p6 = scmp.ne.s32.totalorder %s585_s28, %s377_s10  ;;  %s450_s11 = smov [#allocation5]  }
  0x3e   : > { %140 = vst [vmem:[%s133_s27] sm:$0xf] %v139_v5  ;;  %vm146_vm1 = vcmp.ge.f32.partialorder %v145_v6, 1.0  ;;  %s381_s13 = sshll.u32 %s450_s11, 4  ;;  %s382_s13 = int_to_ptr.vmem [resolvable:$false] %s381_s13 }
  0x3f   : > { %v282_v8 = vsel %vm146_vm1, 1.0, %v449_v2  ;;  %v154_v9 = vsel %vm146_vm1, 0.0, %v145_v6  ;;  %p379_p12 = pnand %p378_p6, %p638_p11  ;;  %s383_s14 = scalar_lea.vmem %s382_s13, 512 }
  0x40   : > { %v149_v10 = vpack.c.bf16 %v282_v8, %v282_v8  ;;  %v158_v11 = vadd.f32 %v284_v7, %v154_v9  ;;  %p384_p4 = scmp.lt.s32.totalorder %s585_s28, %s382_s13  ;;  %p385_p10 = scmp.lt.s32.totalorder %s383_s14, %s377_s10 }
  0x41   : > { %p380_p13 = pneg %p379_p12 }
  0x42   : > { %283 = vst [vmem:[%s133_s27 + $0x4] sm:$0xf] %v149_v10  ;;  %vm159_vm2 = vcmp.ge.f32.partialorder %v158_v11, 1.0  ;;  %p386_p1 = por %p385_p10, %p384_p4 }
  0x43   : > { %v285_v13 = vsel %vm159_vm2, 1.0, %v449_v2  ;;  %v167_v14 = vsel %vm159_vm2, 0.0, %v158_v11 }
  0x44   : > { %v162_v15 = vpack.c.bf16 %v285_v13, %v285_v13  ;;  %v171_v16 = vadd.f32 %v287_v12, %v167_v14  ;;  %p387_p3 = pnand %p386_p1, %p380_p13 }
  0x46   : > { %286 = vst [vmem:[%s133_s27 + $0x8] sm:$0xf] %v162_v15  ;;  %vm172_vm3 = vcmp.ge.f32.partialorder %v171_v16, 1.0 }
  0x47   : > { %v288_v17 = vsel %vm172_vm3, 1.0, %v449_v2 }
  0x48   : > { %v175_v18 = vpack.c.bf16 %v288_v17, %v288_v17 }
  0x4a   : > { %289 = vst [vmem:[%s133_s27 + $0xc] sm:$0xf] %v175_v18 }
  0x4b   : > { %390 = shalt.err (!%p387_p3)
}
  0x4c   : > { %s391_s16 = scalar_lea.hbm %s583_s4, 256  ;;  %s395_s22 = scalar_lea.hbm %s630_s1, 512 }
  0x4d   : > { %p392_p5 = scmp.ne.s32.totalorder %s583_s4, %s391_s16  ;;  %p396_p9 = scmp.lt.u32.totalorder %s583_s4, %s630_s1 }
  0x4e   : > { %p397_p0 = scmp.lt.u32.totalorder %s395_s22, %s391_s16  ;;  %p399_p6 = scmp.lt.u32.totalorder %s391_s16, %s583_s4 }
  0x4f   : > { %p393_p7 = pnand %p392_p5, %p638_p11 }
  0x50   : > { %p398_p2 = por %p397_p0, %p396_p9 }
  0x51   : > { %p394_p8 = pneg %p393_p7 }
  0x52   : > { %p400_p12 = por %p399_p6, %p398_p2 }
  0x54   : > { %p401_p13 = pnand %p400_p12, %p394_p8 }
  0x56   : > { %404 = shalt.err (!%p401_p13)
}
  0x57   : > { %s451_s30 = smov 64   ;;  %s452_s2 = smov 128  }
  0x58   : > { %s453_s25 = smov 4  }
  0x59   : > { %296 = dma.vmem_to_hbm [thread:$0]  (%p638_p11), %s585_s28, 256, %s583_s4, %s181_s5, %s451_s30, %s452_s2, %s453_s25  }
  0x5a PF: > { %s208_s27 = sand.u32 1, %s431_s6   ;;  %p639_p4 = scmp.ne.s32.totalorder %s635_s19, 0 }
  0x5b   : > { %p640_p10 = scmp.ge.s32.totalorder %s443_s9, 2  ;;  %s209_s17 = scalar_lea.sflag [#allocation4], %s208_s27 }
  0x5d   : > { %p303_p1 = pnand %p640_p10, %p639_p4 }
  0x5f   : > { %426 = dma.done.wait (!%p303_p1), %s209_s17, 256  }
  0x60   : > { %428 = vsyncadd (!%p303_p1), %s209_s17, 4294967040  ;;  %p14_p3 = scmp.ge.s32.totalorder %s489_s12, 4   ;;  %s641_s6 = smov %s435_s7 }
  0x61   : > { %s642_s7 = smov %s439_s8  ;;  %s643_s8 = smov %s501_s15 }
  0x62   : > { %s644_s9 = smov %s489_s12  ;;  %16 = sbr.rel (!%p14_p3) target bundleno = 5 (0x5), region = 75 }
  0x69   :  { %214 = vsyncpa [#allocation3], 1 }
  0x6a   :  { %216 = vsyncpa [#allocation3 + $0x1], 1 }
  0x6b   :  { %217 = vsyncpa [#allocation4], 1 }
  0x6c   :  { %219 = vsyncpa [#allocation4 + $0x1], 1 }

</bundles_post_ra>
